<compile_context>
chip_gen: v5e
topology: v5e:2x2
jax: 0.10.0
libtpu: 0.0.40
codegen_flags: <defaults>
</compile_context>

<pallas_src>
import functools

import jax
import jax.numpy as jnp
from jax.experimental import pallas as pl
from jax.experimental.pallas import tpu as pltpu


def _identity_kernel(x_ref, o_ref):
    # Hot path: copy the whole VMEM tile (output is aliased to the input).
    o_ref[...] = x_ref[...]


_LANE = 128
_TARGET_BLOCK_BYTES = 4 * 1024 * 1024  # ~4 MiB/block; 2x-buffered in+out ~16 MiB


@functools.partial(jax.jit, donate_argnums=0)
def identity_pallas(x: jax.Array) -> jax.Array:
    """Identity forward pass: returns x (same shape, same dtype, same values)."""
    if x.size == 0:
        return x

    itemsize = jnp.dtype(x.dtype).itemsize
    # dtype-aware packed sublane multiple: 8 (f32), 16 (bf16), 32 (int8/fp8).
    sublane_mult = max(8, 32 // max(itemsize, 1))

    # Widest lane-dense column count that gives a padding-free 2D view.
    cols = None
    for cand in (2048, 1024, 512, 256, 128):
        if x.size % (cand * sublane_mult) == 0:
            cols = cand
            break

    if cols is None:
        # Awkward element count: single full-array block (no (8,128) constraint
        # when block_shape == full dims).  Fine for small / odd shapes.
        # TODO(synk): for huge awkward sizes, split into a tiled bulk + small tail.
        return pl.pallas_call(
            _identity_kernel,
            out_shape=jax.ShapeDtypeStruct(x.shape, x.dtype),
            input_output_aliases={0: 0},
        )(x)

    rows = x.size // cols          # multiple of sublane_mult by construction
    x2d = x.reshape(rows, cols)    # contiguous reshape: bitcast, no HBM copy

    # ~4 MiB blocks, rounded to a whole packed-vreg sublane multiple.
    block_rows = (_TARGET_BLOCK_BYTES // (cols * itemsize)) // sublane_mult * sublane_mult
    block_rows = min(rows, max(sublane_mult, block_rows))
    grid = (pl.cdiv(rows, block_rows),)   # partial last block is masked by Pallas

    out2d = pl.pallas_call(
        _identity_kernel,
        out_shape=jax.ShapeDtypeStruct((rows, cols), x.dtype),
        grid=grid,
        in_specs=[pl.BlockSpec((block_rows, cols), lambda i: (i, 0))],
        out_specs=pl.BlockSpec((block_rows, cols), lambda i: (i, 0)),
        input_output_aliases={0: 0},
        compiler_params=pltpu.CompilerParams(
            dimension_semantics=("parallel",),
            vmem_limit_bytes=32 * 1024 * 1024,  # safe on v5e/v6e/v7x; >2x our usage
        ),
    )(x2d)

    return out2d.reshape(x.shape)


if __name__ == "__main__":
    key = jax.random.PRNGKey(0)
    shape, dtype = (2, 4, 16, 16), jnp.float32

    x = jax.random.normal(key, shape, dtype=dtype)
    # `x` is donated to the kernel (that is what makes the in-place aliasing
    # real), so build an independent reference from the same deterministic key.
    x_expected = jax.random.normal(key, shape, dtype=dtype)

    y = identity_pallas(x)
    jax.block_until_ready(y)

    assert y.shape == shape, (y.shape, shape)
    assert y.dtype == dtype, (y.dtype, dtype)
    assert bool(jnp.array_equal(y, x_expected)), "identity mismatch"

    print("KERNEL_OK")
</pallas_src>

<mosaic_0001>
module attributes {stable_mosaic.version = 11 : i64} {
  func.func @_identity_kernel(%arg0: i32, %arg1: memref<8x256xf32, #tpu.memory_space<vmem>>, %arg2: memref<8x256xf32, #tpu.memory_space<vmem>>) attributes {dimension_semantics = [#tpu.dimension_semantics<parallel>], iteration_bounds = array<i64: 1>, scalar_prefetch = 0 : i64, scratch_operands = 0 : i64, tpu.core_type = #tpu.core_type<tc>, window_params = [{transform_indices = @transform_0, window_bounds = array<i64: 8, 256>}, {transform_indices = @transform_1, window_bounds = array<i64: 8, 256>}]} {
    %c0 = arith.constant 0 : index
    %c0_0 = arith.constant 0 : index
    %0 = vector.load %arg1[%c0, %c0_0] : memref<8x256xf32, #tpu.memory_space<vmem>>, vector<8x256xf32>
    %c0_1 = arith.constant 0 : index
    %c0_2 = arith.constant 0 : index
    %1 = vector.load %arg2[%c0_1, %c0_2] : memref<8x256xf32, #tpu.memory_space<vmem>>, vector<8x256xf32>
    tpu.vector_store %arg2[%c0_1, %c0_2], %0 {strides = array<i32>} : memref<8x256xf32, #tpu.memory_space<vmem>>, vector<8x256xf32>,
    return
  }
  func.func @transform_0(%arg0: i32) -> (i32, i32) {
    %c0_i32 = arith.constant 0 : i32
    %c0_i32_0 = arith.constant 0 : i32
    return %arg0, %c0_i32 : i32, i32
  }
  func.func @transform_1(%arg0: i32) -> (i32, i32) {
    %c0_i32 = arith.constant 0 : i32
    %c0_i32_0 = arith.constant 0 : i32
    return %arg0, %c0_i32 : i32, i32
  }
}

</mosaic_0001>

<bundles_post_ra>
// kernel: identity_pallas.1
= control target key start
LH: loop header
LB: loop body
LE: loop exit
PB: predicated region body
PF: predicated region fallthrough
CT: control target
= control target key end

     0   :  { %s38_s0 = inlined_call_operand.vmem [shape: f32[8,256], index: 0, kind: input, shape index: {}, may-alias: {0,1}]   ;;  %s39_s1 = inlined_call_operand.vmem [shape: f32[8,256], index: 1, kind: output, shape index: {}, may-alias: {0,1}]  }
   0x1   :  { %v8_v0 = vld [vmem:[%s38_s0] sm:$0xff]  ;;  %v9_v1 = vld [vmem:[%s38_s0 + $0x8] sm:$0xff] }
   0x2   :  { %10 = vst [vmem:[%s39_s1] sm:$0xff] %v8_v0 }
   0x3   :  { %11 = vst [vmem:[%s39_s1 + $0x8] sm:$0xff] %v9_v1 }

</bundles_post_ra>
